<compile_context>
chip_gen: v5e
topology: v5e:2x2
jax: 0.10.0
libtpu: 0.0.40
codegen_flags: <defaults>
</compile_context>

<pallas_src>
import functools

import jax
import jax.numpy as jnp
from jax.experimental import pallas as pl
from jax.experimental.pallas import tpu as pltpu


def _round_up(x, m):
    return ((x + m - 1) // m) * m


def _cdiv(a, b):
    return -(-a // b)


def _chip_kind():
    try:
        return jax.devices()[0].device_kind.lower()
    except Exception:
        return ""


def _kl_partial_kernel(mu_ref, lv_ref, out_ref, acc_ref, *,
                       steps, tile_r, n_rows, needs_mask):
    c = pl.program_id(0)
    i = pl.program_id(1)

    @pl.when(i == 0)
    def _():
        acc_ref[...] = jnp.zeros_like(acc_ref)

    mu = mu_ref[...].astype(jnp.float32)
    lv = lv_ref[...].astype(jnp.float32)
    # exp() lands on the EUP (free slot); everything else is VPU.
    term = 0.5 * (mu * mu + jnp.exp(lv) - 1.0 - lv)

    if needs_mask:
        # Rows at/after n_rows belong to the unspecified-content partial /
        # clamped boundary block: zero them so they contribute nothing.
        blk = c * steps + i
        row = blk * tile_r + jax.lax.broadcasted_iota(jnp.int32, term.shape, 0)
        term = jnp.where(row < n_rows, term, 0.0)

    acc_ref[...] += term          # full-vreg VALU adds, no in-loop reduction

    @pl.when(i == steps - 1)
    def _():
        # One-time cross-sublane collapse (XLU) + lane-dense writeback.
        out_ref[0] = jnp.sum(acc_ref[...], axis=0, keepdims=True)


def l_kl_loss(texture_low_enhanced, texture_ref, loss_weight=1.0, *,
              max_block_elems=None, nsplit=None):
    """Pallas TPU implementation of L_KL.forward."""
    assert texture_low_enhanced.shape == texture_ref.shape
    shape = texture_low_enhanced.shape
    d = shape[-1] if len(shape) else 1
    n_rows = 1
    for s in shape[:-1]:
        n_rows *= s

    lw = jnp.float32(loss_weight)
    if n_rows == 0:          # torch.mean over zero rows -> NaN
        return lw * jnp.float32(jnp.nan)
    if d == 0:               # sum over empty axis -> 0 per row -> mean 0
        return lw * jnp.float32(0.0)

    # Free reshapes (no data movement, no padding copies).
    mu2 = texture_low_enhanced.reshape(n_rows, d)
    lv2 = texture_ref.reshape(n_rows, d)

    kind = _chip_kind()
    is_v7 = ("v7" in kind) or ("tpu7" in kind)
    if nsplit is None:
        nsplit = 2 if is_v7 else 1          # megacore split only where it exists
    if max_block_elems is None:
        max_block_elems = (2048 if is_v7 else 1024) * 512

    itemsize = max(jnp.dtype(mu2.dtype).itemsize, jnp.dtype(lv2.dtype).itemsize)
    sub = max(8, 32 // itemsize)            # sublane granule per input dtype
    lane_padded = _round_up(d, 128)         # VMEM lanes per row

    # TODO(synk): rows whose lane-padded width alone exceeds ~max_block_elems
    # are not re-tiled along the lane axis (unrealistic for texture vectors).
    tile_r = (max_block_elems // lane_padded) // sub * sub
    tile_r = max(sub, min(tile_r, _round_up(_cdiv(n_rows, nsplit), sub)))

    n_blocks = _cdiv(n_rows, tile_r)
    nsplit = min(nsplit, n_blocks)
    steps = _cdiv(n_blocks, nsplit)
    needs_mask = nsplit * steps * tile_r > n_rows

    def data_idx(c, i):
        blk = c * steps + i
        if needs_mask:
            blk = jnp.minimum(blk, n_blocks - 1)   # never a fully-OOB DMA
        return (blk, 0)

    data_spec = pl.BlockSpec((tile_r, d), data_idx)
    out_spec = pl.BlockSpec((1, 1, d), lambda c, i: (c, 0, 0))

    kernel = functools.partial(_kl_partial_kernel, steps=steps, tile_r=tile_r,
                               n_rows=n_rows, needs_mask=needs_mask)

    partials = pl.pallas_call(
        kernel,
        grid=(nsplit, steps),
        in_specs=[data_spec, data_spec],
        out_specs=out_spec,
        out_shape=jax.ShapeDtypeStruct((nsplit, 1, d), jnp.float32),
        scratch_shapes=[pltpu.VMEM((tile_r, d), jnp.float32)],
        compiler_params=pltpu.CompilerParams(
            dimension_semantics=("parallel", "arbitrary"),
            vmem_limit_bytes=32 * 1024 * 1024),
    )(mu2, lv2)

    total_sum = jnp.sum(partials)           # tiny host-side collapse
    return lw * total_sum / jnp.float32(n_rows)


if __name__ == "__main__":
    key = jax.random.PRNGKey(0)
    k1, k2 = jax.random.split(key)

    def ref_loss(m, lv, w):
        return w * jnp.mean(
            0.5 * jnp.sum(m * m + jnp.exp(lv) - 1.0 - lv, axis=-1))

    # "texture vectors": (batch, hidden)
    B, D = 2, 32
    mu = jax.random.normal(k1, (B, D), dtype=jnp.float32)
    logvar = jax.random.normal(k2, (B, D), dtype=jnp.float32)

    loss_weight = 0.5
    loss = jax.block_until_ready(l_kl_loss(mu, logvar, loss_weight=loss_weight))
    ref = ref_loss(mu, logvar, loss_weight)
    assert jnp.allclose(loss, ref, rtol=1e-5, atol=1e-5), (loss, ref)

    # Extra small-shape coverage: ragged row tail, forced core split (serial
    # on 1-TC chips), multi-step grid, and the clamped boundary-block path.
    k3, k4 = jax.random.split(k2)
    x = jax.random.normal(k3, (5, 8, 33), dtype=jnp.float32)   # n_rows=40, D=33
    y = jax.random.normal(k4, (5, 8, 33), dtype=jnp.float32)
    out2 = jax.block_until_ready(
        l_kl_loss(x, y, loss_weight=1.3, max_block_elems=8 * 128, nsplit=2))
    ref2 = ref_loss(x, y, 1.3)
    assert jnp.allclose(out2, ref2, rtol=1e-5, atol=1e-5), (out2, ref2)

    print("KERNEL_OK")
</pallas_src>

<mosaic_0001>
module attributes {stable_mosaic.version = 11 : i64} {
  func.func @_kl_partial_kernel(%arg0: i32, %arg1: i32, %arg2: memref<8x32xf32, #tpu.memory_space<vmem>>, %arg3: memref<8x32xf32, #tpu.memory_space<vmem>>, %arg4: memref<1x1x32xf32, #tpu.memory_space<vmem>>, %arg5: memref<8x32xf32, #tpu.memory_space<vmem>>) attributes {dimension_semantics = [#tpu.dimension_semantics<parallel>, #tpu.dimension_semantics<arbitrary>], iteration_bounds = array<i64: 1, 1>, scalar_prefetch = 0 : i64, scratch_operands = 1 : i64, tpu.core_type = #tpu.core_type<tc>, window_params = [{transform_indices = @transform_0, window_bounds = array<i64: 8, 32>}, {transform_indices = @transform_1, window_bounds = array<i64: 8, 32>}, {transform_indices = @transform_2, window_bounds = array<i64: 1, 1, 32>}]} {
    %c0_i32 = arith.constant 0 : i32
    %0 = arith.cmpi eq, %arg1, %c0_i32 : i32
    %1 = arith.extui %0 : i1 to i32
    %c0_i32_0 = arith.constant 0 : i32
    %2 = arith.cmpi ne, %1, %c0_i32_0 : i32
    scf.if %2 {
      %cst_12 = arith.constant 0.000000e+00 : f32
      %29 = vector.broadcast %cst_12 : f32 to vector<8x32xf32>
      %c0_13 = arith.constant 0 : index
      %c0_14 = arith.constant 0 : index
      %30 = vector.load %arg5[%c0_13, %c0_14] : memref<8x32xf32, #tpu.memory_space<vmem>>, vector<8x32xf32>
      tpu.vector_store %arg5[%c0_13, %c0_14], %29 {strides = array<i32>} : memref<8x32xf32, #tpu.memory_space<vmem>>, vector<8x32xf32>,
    } else {
    }
    %c0 = arith.constant 0 : index
    %c0_1 = arith.constant 0 : index
    %3 = vector.load %arg2[%c0, %c0_1] : memref<8x32xf32, #tpu.memory_space<vmem>>, vector<8x32xf32>
    %c0_2 = arith.constant 0 : index
    %c0_3 = arith.constant 0 : index
    %4 = vector.load %arg3[%c0_2, %c0_3] : memref<8x32xf32, #tpu.memory_space<vmem>>, vector<8x32xf32>
    %5 = arith.mulf %3, %3 : vector<8x32xf32>
    %6 = math.exp %4 : vector<8x32xf32>
    %7 = arith.addf %5, %6 : vector<8x32xf32>
    %cst = arith.constant 1.000000e+00 : f32
    %8 = vector.broadcast %cst : f32 to vector<8x32xf32>
    %9 = arith.subf %7, %8 : vector<8x32xf32>
    %10 = arith.subf %9, %4 : vector<8x32xf32>
    %cst_4 = arith.constant 5.000000e-01 : f32
    %11 = vector.broadcast %cst_4 : f32 to vector<8x32xf32>
    %12 = arith.mulf %11, %10 : vector<8x32xf32>
    %c1_i32 = arith.constant 1 : i32
    %13 = arith.muli %arg0, %c1_i32 : i32
    %14 = arith.addi %13, %arg1 : i32
    %c8_i32 = arith.constant 8 : i32
    %15 = arith.muli %14, %c8_i32 : i32
    %16 = tpu.iota {dimensions = array<i32: 0>} : vector<8x32xi32>
    %17 = vector.broadcast %15 : i32 to vector<8x32xi32>
    %18 = arith.addi %17, %16 : vector<8x32xi32>
    %c2_i32 = arith.constant 2 : i32
    %19 = vector.broadcast %c2_i32 : i32 to vector<8x32xi32>
    %20 = arith.cmpi slt, %18, %19 : vector<8x32xi32>
    %cst_5 = arith.constant 0.000000e+00 : f32
    %21 = vector.broadcast %cst_5 : f32 to vector<8x32xf32>
    %22 = arith.select %20, %12, %21 : vector<8x32xi1>, vector<8x32xf32>
    %c0_6 = arith.constant 0 : index
    %c0_7 = arith.constant 0 : index
    %23 = vector.load %arg5[%c0_6, %c0_7] : memref<8x32xf32, #tpu.memory_space<vmem>>, vector<8x32xf32>
    %24 = arith.addf %23, %22 : vector<8x32xf32>
    %c0_8 = arith.constant 0 : index
    %c0_9 = arith.constant 0 : index
    %25 = vector.load %arg5[%c0_8, %c0_9] : memref<8x32xf32, #tpu.memory_space<vmem>>, vector<8x32xf32>
    tpu.vector_store %arg5[%c0_8, %c0_9], %24 {strides = array<i32>} : memref<8x32xf32, #tpu.memory_space<vmem>>, vector<8x32xf32>,
    %c0_i32_10 = arith.constant 0 : i32
    %26 = arith.cmpi eq, %arg1, %c0_i32_10 : i32
    %27 = arith.extui %26 : i1 to i32
    %c0_i32_11 = arith.constant 0 : i32
    %28 = arith.cmpi ne, %27, %c0_i32_11 : i32
    scf.if %28 {
      %c0_12 = arith.constant 0 : index
      %c0_13 = arith.constant 0 : index
      %29 = vector.load %arg5[%c0_12, %c0_13] : memref<8x32xf32, #tpu.memory_space<vmem>>, vector<8x32xf32>
      %cst_14 = arith.constant dense<0.000000e+00> : vector<32xf32>
      %30 = vector.multi_reduction <add>, %29, %cst_14 [0] : vector<8x32xf32> to vector<32xf32>
      %31 = vector.shape_cast %30 : vector<32xf32> to vector<1x32xf32>
      %c0_15 = arith.constant 0 : index
      %c0_16 = arith.constant 0 : index
      %c0_17 = arith.constant 0 : index
      %32 = vector.load %arg4[%c0_15, %c0_16, %c0_17] : memref<1x1x32xf32, #tpu.memory_space<vmem>>, vector<1x1x32xf32>
      %33 = vector.shape_cast %32 : vector<1x1x32xf32> to vector<1x32xf32>
      %34 = vector.shape_cast %31 : vector<1x32xf32> to vector<1x1x32xf32>
      tpu.vector_store %arg4[%c0_15, %c0_16, %c0_17], %34 {strides = array<i32>} : memref<1x1x32xf32, #tpu.memory_space<vmem>>, vector<1x1x32xf32>,
    } else {
    }
    return
  }
  func.func @transform_0(%arg0: i32, %arg1: i32) -> (i32, i32) {
    %c1_i32 = arith.constant 1 : i32
    %0 = arith.muli %arg0, %c1_i32 : i32
    %1 = arith.addi %0, %arg1 : i32
    %c0_i32 = arith.constant 0 : i32
    %2 = arith.minsi %1, %c0_i32 : i32
    %c0_i32_0 = arith.constant 0 : i32
    %c0_i32_1 = arith.constant 0 : i32
    return %2, %c0_i32_0 : i32, i32
  }
  func.func @transform_1(%arg0: i32, %arg1: i32) -> (i32, i32) {
    %c1_i32 = arith.constant 1 : i32
    %0 = arith.muli %arg0, %c1_i32 : i32
    %1 = arith.addi %0, %arg1 : i32
    %c0_i32 = arith.constant 0 : i32
    %2 = arith.minsi %1, %c0_i32 : i32
    %c0_i32_0 = arith.constant 0 : i32
    %c0_i32_1 = arith.constant 0 : i32
    return %2, %c0_i32_0 : i32, i32
  }
  func.func @transform_2(%arg0: i32, %arg1: i32) -> (i32, i32, i32) {
    %c0_i32 = arith.constant 0 : i32
    %c0_i32_0 = arith.constant 0 : i32
    %c0_i32_1 = arith.constant 0 : i32
    return %arg0, %c0_i32, %c0_i32_0 : i32, i32, i32
  }
}

</mosaic_0001>

<bundles_post_ra>
// kernel: tpu_custom_call.1
= control target key start
LH: loop header
LB: loop body
LE: loop exit
PB: predicated region body
PF: predicated region fallthrough
CT: control target
= control target key end

     0   :  { %7 = vsyncpa [#allocation4], 0  ;;  %s260_s0 = inlined_call_operand.hbm [shape: f32[2,32], index: 0, kind: input, shape index: {}]   ;;  %s261_s1 = inlined_call_operand.hbm [shape: f32[2,32], index: 1, kind: input, shape index: {}]   ;;  %s262_s2 = inlined_call_operand.hbm [shape: f32[1,1,32], index: 2, kind: output, shape index: {}]  }
   0x1   :  { %8 = vsyncpa [#allocation7], 0 }
   0x2   :  { %9 = vsyncpa [#allocation5], 0 }
   0x3   :  { %20 = vsyncadd [#allocation4], 96  ;;  %s25_s11 = sshll.u32 %s260_s0, 4  ;;  %s227_s12 = smov [#allocation3]   ;;  %s26_s11 = int_to_ptr.hbm [resolvable:$true] %s25_s11 }
   0x4   :  { %s27_s13 = sshll.u32 %s227_s12, 4  ;;  %s228_s14 = smov 32   ;;  %s28_s13 = int_to_ptr.vmem [resolvable:$true] %s27_s13 }
   0x5   :  { %s229_s15 = smov 2  }
   0x6   :  { %33 = dma.hbm_to_vmem [thread:$0]  %s26_s11, 32, %s28_s13, [#allocation4], %s228_s14, %s228_s14, %s229_s15  }
   0x7   :  { %44 = vsyncadd [#allocation7], 96  ;;  %s49_s18 = sshll.u32 %s261_s1, 4  ;;  %s230_s19 = smov [#allocation6]   ;;  %s50_s18 = int_to_ptr.hbm [resolvable:$true] %s49_s18 }
   0x8   :  { %s51_s20 = sshll.u32 %s230_s19, 4  ;;  %s52_s20 = int_to_ptr.vmem [resolvable:$true] %s51_s20 }
   0x9   :  { %57 = dma.hbm_to_vmem [thread:$0]  %s50_s18, 32, %s52_s20, [#allocation7], %s228_s14, %s228_s14, %s229_s15  }
   0xa   :  { %221 = dma.done.wait [#allocation4], 128  }
   0xb   :  { %222 = vsyncadd [#allocation4], 4294967168 }
   0xc   :  { %223 = dma.done.wait [#allocation7], 128  }
   0xd   :  { %224 = vsyncadd [#allocation7], 4294967168  ;;  %vm82_vm0 = vcmask 261120   ;;  %v231_v0 = vmov 0.0   ;;  %v85_v1 = vld [vmem:[#allocation6] sm:$0xff]  ;;  %v84_v3 = vld [vmem:[#allocation3] sm:$0xff]  ;;  %v95_v5 = vlaneseq }
   0xe   :  { %83 = vst.msk [vmem:[#allocation2] sm:$0xff] %vm82_vm0, %v231_v0  ;;  %v87_v2 = vmul.f32 1.442695, %v85_v1  ;;  %v86_v4 = vmul.f32 %v84_v3, %v84_v3  ;;  %s232_s0 = smov [#allocation8]   ;;  %s125_s23 = sshll.u32 %s262_s2, 4  ;;  %vm116_vm2 = vcmask 253952   ;;  %s126_s23 = int_to_ptr.hbm [resolvable:$true] %s125_s23 }
   0xf   :  { %v96_v8 = vshrl.u32 %v95_v5, 7  ;;  %s123_s1 = sshll.u32 %s232_s0, 4  ;;  %s124_s1 = int_to_ptr.vmem [resolvable:$true] %s123_s1 }
  0x10   :  { %147 = vpow2.f32 %v87_v2 }
  0x11   :  { %vm99_vm1 = vcmp.lt.s32.totalorder %v96_v8, 2 }
  0x15   :  { %v101_v12 = vld [vmem:[#allocation2] sm:$0xff] }
  0x16   :  { %v148_v6 = vpop.eup %147 }
  0x17   :  { %v89_v7 = vadd.f32 %v148_v6, %v86_v4 }
  0x19   :  { %v140_v9 = vadd.f32 -1.0, %v89_v7 }
  0x1b   :  { %v91_v10 = vsub.f32 %v140_v9, %v85_v1 }
  0x1d   :  { %v92_v11 = vmul.f32 0.5, %v91_v10 }
  0x1f   :  { %v100_v13 = vsel %vm99_vm1, %v92_v11, 0.0 }
  0x20   :  { %v102_v14 = vadd.f32 %v101_v12, %v100_v13 }
  0x22   :  { %104 = vst.msk [vmem:[#allocation2] sm:$0xff] %vm82_vm0, %v102_v14 }
  0x29   :  { %v108_v15 = vld [vmem:[#allocation2] sm:$0xff] }
  0x2a   :  { %v109_v16 = vsel %vm82_vm0, %v108_v15, 0.0 }
  0x2b   :  { %v110_v17 = vrot.slane %v109_v16, 4 }
  0x2d   :  { %v111_v18 = vadd.f32 %v110_v17, %v109_v16 }
  0x2f   :  { %v112_v19 = vrot.slane %v111_v18, 2 }
  0x31   :  { %v113_v20 = vadd.f32 %v112_v19, %v111_v18 }
  0x33   :  { %v114_v21 = vrot.slane %v113_v20, 1 }
  0x35   :  { %v115_v22 = vadd.f32 %v114_v21, %v113_v20 }
  0x37   :  { %117 = vst.msk [vmem:[#allocation8] sm:$0x1] %vm116_vm2, %v115_v22 }
  0x38   :  { %128 = dma.vmem_to_hbm [thread:$0]  %s124_s1, 16, %s126_s23, [#allocation5]  }
  0x39   :  { %225 = dma.done.wait [#allocation5], 16  }
  0x3a   :  { %226 = vsyncadd [#allocation5], 4294967280 }
  0x3b   :  { %133 = vsyncpa [#allocation4], 1 }
  0x3c   :  { %134 = vsyncpa [#allocation7], 1 }
  0x3d   :  { %135 = vsyncpa [#allocation5], 1 }

</bundles_post_ra>
